<compile_context>
chip_gen: v7x
topology: tpu7x:2x2x1
jax: 0.10.0
libtpu: 0.0.40
codegen_flags: <defaults>
</compile_context>

<pallas_src>
import functools

import jax
import jax.numpy as jnp
from jax.experimental import pallas as pl
from jax.experimental.pallas import tpu as pltpu

HIDDEN = 100
TM_MAX = 1024          # max batch-tile rows (mult. of 256 -> good on v5e/v6e/v7x)
SUBLANE = 8            # x tile is f32 (cast to bf16 in-kernel), so 8-row alignment


def _round_up(x, m):
    return (x + m - 1) // m * m


def _cdiv(a, b):
    return -(-a // b)


def _mlp_kernel(return_rep, x_ref, w1_ref, b1_ref, w2_ref, b2_ref,
                wc_ref, bc_ref, *out_refs):
    """Fused MLP forward: fc1+ReLU, fc2+ReLU, fused (classifier1|classifier2).

    x arrives f32 and is cast to bf16 on the VPU (hidden under the MXU/DMA).
    Weight blocks use constant index_maps, so they are DMA'd once and stay
    resident across batch steps. All MXU outputs are lane-dense.
    """
    logits_ref = out_refs[0]

    x = x_ref[...].astype(jnp.bfloat16)               # (TM, IN)  cast in-kernel

    # fc1 + ReLU  (bf16 MXU, f32 accumulate; bias add + ReLU in f32)
    h1 = jnp.dot(x, w1_ref[...], preferred_element_type=jnp.float32)
    h1 = jnp.maximum(h1 + b1_ref[...], 0.0)

    # fc2 + ReLU
    h2 = jnp.dot(h1.astype(jnp.bfloat16), w2_ref[...],
                 preferred_element_type=jnp.float32)
    h2 = jnp.maximum(h2 + b2_ref[...], 0.0)

    if return_rep:                                     # static Python bool
        out_refs[1][...] = h2.astype(out_refs[1].dtype)

    # Fused classifier heads: one matmul producing [logits1 | logits2 | pad]
    logits = jnp.dot(h2.astype(jnp.bfloat16), wc_ref[...],
                     preferred_element_type=jnp.float32) + bc_ref[...]
    logits_ref[...] = logits.astype(logits_ref.dtype)


def _xavier_uniform(key, fan_in, fan_out, dtype=jnp.float32):
    """Xavier/Glorot uniform init, matching torch.nn.init.xavier_uniform_."""
    limit = jnp.sqrt(6.0 / (fan_in + fan_out)).astype(dtype)
    # Stored as (in, out) so the kernel can do x @ W directly.
    return jax.random.uniform(key, (fan_in, fan_out), dtype=dtype,
                              minval=-limit, maxval=limit)


def init_params(key, input_size, output_size, hidden=HIDDEN):
    """Logical (unpadded, f32) parameters; weights (in, out), biases (1, out)."""
    k1, k2, k3, k4 = jax.random.split(key, 4)
    w1 = _xavier_uniform(k1, input_size, hidden)
    b1 = jnp.zeros((1, hidden), jnp.float32)
    w2 = _xavier_uniform(k2, hidden, hidden)
    b2 = jnp.zeros((1, hidden), jnp.float32)
    wc1 = _xavier_uniform(k3, hidden, output_size)
    bc1 = jnp.zeros((1, output_size), jnp.float32)
    wc2 = _xavier_uniform(k4, hidden, output_size)
    bc2 = jnp.zeros((1, output_size), jnp.float32)
    return (w1, b1, w2, b2, wc1, bc1, wc2, bc2)


def pack_params(params, input_size, output_size, hidden=HIDDEN):
    """Pad hidden/output dims to lane multiples, fuse classifier heads, cast
    weights to bf16. The input (K) dim of w1 is left UNPADDED to match the
    unpadded x feature dim. Padding rows/cols are zero so padded lanes produce
    exact zeros and can be sliced off in the wrapper.
    NOTE: if parameters are ever updated in packed form, pad lanes must stay 0.
    """
    w1, b1, w2, b2, wc1, bc1, wc2, bc2 = params
    h_pad = _round_up(hidden, 128)
    out_pad = _round_up(2 * output_size, 128)

    def pad2(a, rows, cols):
        return jnp.pad(a, ((0, rows - a.shape[0]), (0, cols - a.shape[1])))

    w1p = pad2(w1, input_size, h_pad).astype(jnp.bfloat16)      # (in, h_pad)
    b1p = pad2(b1, 1, h_pad)                                    # f32
    w2p = pad2(w2, h_pad, h_pad).astype(jnp.bfloat16)
    b2p = pad2(b2, 1, h_pad)                                    # f32
    wc = jnp.concatenate([wc1, wc2], axis=1)                    # (hidden, 2*out)
    bc = jnp.concatenate([bc1, bc2], axis=1)
    wcp = pad2(wc, h_pad, out_pad).astype(jnp.bfloat16)
    bcp = pad2(bc, 1, out_pad)                                  # f32
    return (w1p, b1p, w2p, b2p, wcp, bcp)


@functools.partial(jax.jit, static_argnames=("hidden", "output_size", "return_rep"))
def mnist_mlp_forward(x, packed_params, *, hidden, output_size, return_rep=False):
    """Runs the fused Pallas kernel. x: (B, ...) -> flattened to (B, input_size)."""
    w1p, b1p, w2p, b2p, wcp, bcp = packed_params
    in_dim, h_pad = w1p.shape
    out_pad = wcp.shape[1]

    # Mirrors x.view(-1, num_flat_features(x))
    x = x.reshape(x.shape[0], -1)
    batch, input_size = x.shape
    assert input_size == in_dim

    # Batch tiling: tm multiple of 8 (sublane, f32 x tiles), capped at TM_MAX,
    # chosen to minimize batch padding. Force >= 2 grid steps when the batch is
    # big enough so both v7x TensorCores get work ("parallel" axis).
    num_steps = max(_cdiv(batch, TM_MAX), 1)
    if batch >= 2 * SUBLANE:
        num_steps = max(num_steps, 2)
    tm = _round_up(_cdiv(batch, num_steps), SUBLANE)
    b_pad = tm * num_steps

    # Only row padding of the batch; no feature-dim padding, no wrapper cast.
    x_p = x if b_pad == batch else jnp.pad(x, ((0, b_pad - batch), (0, 0)))

    grid = (num_steps,)
    const = lambda i: (0, 0)     # weights/biases: resident across batch steps
    batched = lambda i: (i, 0)   # per-batch-tile blocks

    in_specs = [
        pl.BlockSpec((tm, in_dim), batched),     # x: last dim == full array dim
        pl.BlockSpec((in_dim, h_pad), const),
        pl.BlockSpec((1, h_pad), const),
        pl.BlockSpec((h_pad, h_pad), const),
        pl.BlockSpec((1, h_pad), const),
        pl.BlockSpec((h_pad, out_pad), const),
        pl.BlockSpec((1, out_pad), const),
    ]

    # bf16 outputs: halves writeback; upcast to f32 after slicing below.
    out_shapes = [jax.ShapeDtypeStruct((b_pad, out_pad), jnp.bfloat16)]
    out_specs = [pl.BlockSpec((tm, out_pad), batched)]
    if return_rep:
        out_shapes.append(jax.ShapeDtypeStruct((b_pad, h_pad), jnp.bfloat16))
        out_specs.append(pl.BlockSpec((tm, h_pad), batched))

    outs = pl.pallas_call(
        functools.partial(_mlp_kernel, return_rep),
        grid=grid,
        out_shape=tuple(out_shapes),
        in_specs=in_specs,
        out_specs=tuple(out_specs),
        compiler_params=pltpu.CompilerParams(
            dimension_semantics=("parallel",)),
    )(x_p, w1p, b1p, w2p, b2p, wcp, bcp)

    logits_fused = outs[0]
    logits1 = logits_fused[:batch, :output_size].astype(jnp.float32)
    logits2 = logits_fused[:batch, output_size:2 * output_size].astype(jnp.float32)
    result = {"logits1": logits1, "logits2": logits2, "logits3": None}
    if return_rep:
        result["features"] = outs[1][:batch, :hidden].astype(jnp.float32)
    return result


if __name__ == "__main__":
    key = jax.random.PRNGKey(0)
    kx, kp = jax.random.split(key)

    batch, input_size, output_size = 8, 784, 10

    # Input arrives as images; forward() flattens with view(-1, input_size).
    x_img = jax.random.normal(kx, (batch, 1, 28, 28), dtype=jnp.float32)

    params = init_params(kp, input_size, output_size)
    packed = pack_params(params, input_size, output_size)

    out = mnist_mlp_forward(x_img, packed, hidden=HIDDEN,
                            output_size=output_size, return_rep=True)
    jax.block_until_ready((out["logits1"], out["logits2"], out["features"]))

    # Inference path: no features writeback.
    out_inf = mnist_mlp_forward(x_img, packed, hidden=HIDDEN,
                                output_size=output_size, return_rep=False)
    jax.block_until_ready((out_inf["logits1"], out_inf["logits2"]))

    # Reference matching the kernel's bf16-quantized operands / f32 accumulation
    # (final outputs are bf16-rounded, covered by the 2e-2 tolerance).
    w1, b1, w2, b2, wc1, bc1, wc2, bc2 = params
    x = x_img.reshape(batch, -1)
    q = lambda a: a.astype(jnp.bfloat16).astype(jnp.float32)
    h1 = jnp.maximum(q(x) @ q(w1) + b1, 0.0)
    h2 = jnp.maximum(q(h1) @ q(w2) + b2, 0.0)
    ref1 = q(h2) @ q(wc1) + bc1
    ref2 = q(h2) @ q(wc2) + bc2

    assert out["logits1"].shape == (batch, output_size)
    assert out["logits2"].shape == (batch, output_size)
    assert out["logits3"] is None
    assert out["features"].shape == (batch, HIDDEN)
    assert jnp.allclose(out["logits1"], ref1, atol=2e-2, rtol=2e-2)
    assert jnp.allclose(out["logits2"], ref2, atol=2e-2, rtol=2e-2)
    assert jnp.allclose(out["features"], h2, atol=2e-2, rtol=2e-2)
    assert jnp.allclose(out_inf["logits1"], out["logits1"])
    assert jnp.allclose(out_inf["logits2"], out["logits2"])

    print("KERNEL_OK")
</pallas_src>

<mosaic_0001>
module attributes {stable_mosaic.version = 11 : i64} {
  func.func @_mlp_kernel(%arg0: i32, %arg1: memref<8x784xf32, #tpu.memory_space<vmem>>, %arg2: memref<784x128xbf16, #tpu.memory_space<vmem>>, %arg3: memref<1x128xf32, #tpu.memory_space<vmem>>, %arg4: memref<128x128xbf16, #tpu.memory_space<vmem>>, %arg5: memref<1x128xf32, #tpu.memory_space<vmem>>, %arg6: memref<128x128xbf16, #tpu.memory_space<vmem>>, %arg7: memref<1x128xf32, #tpu.memory_space<vmem>>, %arg8: memref<8x128xbf16, #tpu.memory_space<vmem>>, %arg9: memref<8x128xbf16, #tpu.memory_space<vmem>>) attributes {dimension_semantics = [#tpu.dimension_semantics<parallel>], iteration_bounds = array<i64: 1>, scalar_prefetch = 0 : i64, scratch_operands = 0 : i64, tpu.core_type = #tpu.core_type<tc>, window_params = [{transform_indices = @transform_0, window_bounds = array<i64: 8, 784>}, {pipeline_mode = #tpu.pipeline_mode<synchronous>, transform_indices = @transform_1, window_bounds = array<i64: 784, 128>}, {pipeline_mode = #tpu.pipeline_mode<synchronous>, transform_indices = @transform_2, window_bounds = array<i64: 1, 128>}, {pipeline_mode = #tpu.pipeline_mode<synchronous>, transform_indices = @transform_3, window_bounds = array<i64: 128, 128>}, {pipeline_mode = #tpu.pipeline_mode<synchronous>, transform_indices = @transform_4, window_bounds = array<i64: 1, 128>}, {pipeline_mode = #tpu.pipeline_mode<synchronous>, transform_indices = @transform_5, window_bounds = array<i64: 128, 128>}, {pipeline_mode = #tpu.pipeline_mode<synchronous>, transform_indices = @transform_6, window_bounds = array<i64: 1, 128>}, {transform_indices = @transform_7, window_bounds = array<i64: 8, 128>}, {transform_indices = @transform_8, window_bounds = array<i64: 8, 128>}]} {
    %c0 = arith.constant 0 : index
    %c0_0 = arith.constant 0 : index
    %0 = vector.load %arg1[%c0, %c0_0] : memref<8x784xf32, #tpu.memory_space<vmem>>, vector<8x784xf32>
    %1 = arith.truncf %0 : vector<8x784xf32> to vector<8x784xbf16>
    %c0_1 = arith.constant 0 : index
    %c0_2 = arith.constant 0 : index
    %2 = vector.load %arg2[%c0_1, %c0_2] : memref<784x128xbf16, #tpu.memory_space<vmem>>, vector<784x128xbf16>
    %cst = arith.constant dense<0.000000e+00> : vector<8x128xf32>
    %3 = tpu.matmul %1, %2, %cst {dimension_numbers = #tpu.dot_dimension_numbers<[1], [0], [0], [1], [0, 0, 1, 1], [], []>} : vector<8x784xbf16>, vector<784x128xbf16>, vector<8x128xf32> -> vector<8x128xf32>
    %c0_3 = arith.constant 0 : index
    %c0_4 = arith.constant 0 : index
    %4 = vector.load %arg3[%c0_3, %c0_4] : memref<1x128xf32, #tpu.memory_space<vmem>>, vector<1x128xf32>
    %5 = vector.broadcast %4 : vector<1x128xf32> to vector<8x128xf32>
    %6 = arith.addf %3, %5 : vector<8x128xf32>
    %cst_5 = arith.constant 0.000000e+00 : f32
    %7 = vector.broadcast %cst_5 : f32 to vector<8x128xf32>
    %8 = arith.maximumf %6, %7 : vector<8x128xf32>
    %9 = arith.truncf %8 : vector<8x128xf32> to vector<8x128xbf16>
    %c0_6 = arith.constant 0 : index
    %c0_7 = arith.constant 0 : index
    %10 = vector.load %arg4[%c0_6, %c0_7] : memref<128x128xbf16, #tpu.memory_space<vmem>>, vector<128x128xbf16>
    %cst_8 = arith.constant dense<0.000000e+00> : vector<8x128xf32>
    %11 = tpu.matmul %9, %10, %cst_8 {dimension_numbers = #tpu.dot_dimension_numbers<[1], [0], [0], [1], [0, 0, 1, 1], [], []>} : vector<8x128xbf16>, vector<128x128xbf16>, vector<8x128xf32> -> vector<8x128xf32>
    %c0_9 = arith.constant 0 : index
    %c0_10 = arith.constant 0 : index
    %12 = vector.load %arg5[%c0_9, %c0_10] : memref<1x128xf32, #tpu.memory_space<vmem>>, vector<1x128xf32>
    %13 = vector.broadcast %12 : vector<1x128xf32> to vector<8x128xf32>
    %14 = arith.addf %11, %13 : vector<8x128xf32>
    %cst_11 = arith.constant 0.000000e+00 : f32
    %15 = vector.broadcast %cst_11 : f32 to vector<8x128xf32>
    %16 = arith.maximumf %14, %15 : vector<8x128xf32>
    %17 = arith.truncf %16 : vector<8x128xf32> to vector<8x128xbf16>
    %c0_12 = arith.constant 0 : index
    %c0_13 = arith.constant 0 : index
    %18 = vector.load %arg9[%c0_12, %c0_13] : memref<8x128xbf16, #tpu.memory_space<vmem>>, vector<8x128xbf16>
    tpu.vector_store %arg9[%c0_12, %c0_13], %17 {strides = array<i32>} : memref<8x128xbf16, #tpu.memory_space<vmem>>, vector<8x128xbf16>,
    %19 = arith.truncf %16 : vector<8x128xf32> to vector<8x128xbf16>
    %c0_14 = arith.constant 0 : index
    %c0_15 = arith.constant 0 : index
    %20 = vector.load %arg6[%c0_14, %c0_15] : memref<128x128xbf16, #tpu.memory_space<vmem>>, vector<128x128xbf16>
    %cst_16 = arith.constant dense<0.000000e+00> : vector<8x128xf32>
    %21 = tpu.matmul %19, %20, %cst_16 {dimension_numbers = #tpu.dot_dimension_numbers<[1], [0], [0], [1], [0, 0, 1, 1], [], []>} : vector<8x128xbf16>, vector<128x128xbf16>, vector<8x128xf32> -> vector<8x128xf32>
    %c0_17 = arith.constant 0 : index
    %c0_18 = arith.constant 0 : index
    %22 = vector.load %arg7[%c0_17, %c0_18] : memref<1x128xf32, #tpu.memory_space<vmem>>, vector<1x128xf32>
    %23 = vector.broadcast %22 : vector<1x128xf32> to vector<8x128xf32>
    %24 = arith.addf %21, %23 : vector<8x128xf32>
    %25 = arith.truncf %24 : vector<8x128xf32> to vector<8x128xbf16>
    %c0_19 = arith.constant 0 : index
    %c0_20 = arith.constant 0 : index
    %26 = vector.load %arg8[%c0_19, %c0_20] : memref<8x128xbf16, #tpu.memory_space<vmem>>, vector<8x128xbf16>
    tpu.vector_store %arg8[%c0_19, %c0_20], %25 {strides = array<i32>} : memref<8x128xbf16, #tpu.memory_space<vmem>>, vector<8x128xbf16>,
    return
  }
  func.func @transform_0(%arg0: i32) -> (i32, i32) {
    %c0_i32 = arith.constant 0 : i32
    %c0_i32_0 = arith.constant 0 : i32
    return %arg0, %c0_i32 : i32, i32
  }
  func.func @transform_1(%arg0: i32) -> (i32, i32) {
    %c0_i32 = arith.constant 0 : i32
    %c0_i32_0 = arith.constant 0 : i32
    %c0_i32_1 = arith.constant 0 : i32
    return %c0_i32, %c0_i32_0 : i32, i32
  }
  func.func @transform_2(%arg0: i32) -> (i32, i32) {
    %c0_i32 = arith.constant 0 : i32
    %c0_i32_0 = arith.constant 0 : i32
    %c0_i32_1 = arith.constant 0 : i32
    return %c0_i32, %c0_i32_0 : i32, i32
  }
  func.func @transform_3(%arg0: i32) -> (i32, i32) {
    %c0_i32 = arith.constant 0 : i32
    %c0_i32_0 = arith.constant 0 : i32
    %c0_i32_1 = arith.constant 0 : i32
    return %c0_i32, %c0_i32_0 : i32, i32
  }
  func.func @transform_4(%arg0: i32) -> (i32, i32) {
    %c0_i32 = arith.constant 0 : i32
    %c0_i32_0 = arith.constant 0 : i32
    %c0_i32_1 = arith.constant 0 : i32
    return %c0_i32, %c0_i32_0 : i32, i32
  }
  func.func @transform_5(%arg0: i32) -> (i32, i32) {
    %c0_i32 = arith.constant 0 : i32
    %c0_i32_0 = arith.constant 0 : i32
    %c0_i32_1 = arith.constant 0 : i32
    return %c0_i32, %c0_i32_0 : i32, i32
  }
  func.func @transform_6(%arg0: i32) -> (i32, i32) {
    %c0_i32 = arith.constant 0 : i32
    %c0_i32_0 = arith.constant 0 : i32
    %c0_i32_1 = arith.constant 0 : i32
    return %c0_i32, %c0_i32_0 : i32, i32
  }
  func.func @transform_7(%arg0: i32) -> (i32, i32) {
    %c0_i32 = arith.constant 0 : i32
    %c0_i32_0 = arith.constant 0 : i32
    return %arg0, %c0_i32 : i32, i32
  }
  func.func @transform_8(%arg0: i32) -> (i32, i32) {
    %c0_i32 = arith.constant 0 : i32
    %c0_i32_0 = arith.constant 0 : i32
    return %arg0, %c0_i32 : i32, i32
  }
}

</mosaic_0001>

<bundles_post_ra>
// kernel: mnist_mlp_forward.1
= control target key start
LH: loop header
LB: loop body
LE: loop exit
PB: predicated region body
PF: predicated region fallthrough
CT: control target
= control target key end

     0   :  { %v1111_v44 = vmov 0.0   ;;  %vm1112_vm0 = vmmov 0   ;;  %vm442_vm1 = vcmask 130048   ;;  %s1412_s1 = inlined_call_operand.vmem [shape: bf16[784,128], index: 1, kind: input, shape index: {}]   ;;  %s1413_s0 = inlined_call_operand.vmem [shape: f32[8,784], index: 0, kind: input, shape index: {}]   ;;  %s1414_s3 = inlined_call_operand.vmem [shape: bf16[128,128], index: 3, kind: input, shape index: {}]   ;;  %s1415_s5 = inlined_call_operand.vmem [shape: bf16[128,128], index: 5, kind: input, shape index: {}]   ;;  %s1416_s2 = inlined_call_operand.vmem [shape: f32[1,128], index: 2, kind: input, shape index: {}]   ;;  %s1417_s4 = inlined_call_operand.vmem [shape: f32[1,128], index: 4, kind: input, shape index: {}]   ;;  %s1418_s8 = inlined_call_operand.vmem [shape: bf16[8,128], index: 8, kind: output, shape index: {1}]   ;;  %s1419_s6 = inlined_call_operand.vmem [shape: f32[1,128], index: 6, kind: input, shape index: {}]   ;;  %s1420_s7 = inlined_call_operand.vmem [shape: bf16[8,128], index: 7, kind: output, shape index: {0}]  }
   0x1   :  { %v1046_v0 = vld [vmem:[%s1412_s1 + $0x40] sm:$0xff]   ;;  %v1050_v4 = vld [vmem:[%s1412_s1 + $0x48] sm:$0xff]   ;;  %v1054_v8 = vld [vmem:[%s1412_s1 + $0x50] sm:$0xff]  }
   0x2   :  { %v1047_v1 = vld [vmem:[%s1412_s1] sm:$0xff]   ;;  %912 = vmatprep.subr.bf16.mxu0 %v1046_v0  ;;  %v1051_v5 = vld [vmem:[%s1412_s1 + $0x8] sm:$0xff]   ;;  %v1055_v9 = vld [vmem:[%s1412_s1 + $0x10] sm:$0xff]  }
   0x3   :  { %v1048_v2 = vld [vmem:[%s1412_s1 + $0xc0] sm:$0xff]   ;;  %913 = vmatpush3.bf16.msra.mxu0 %v1047_v1  ;;  %v1052_v6 = vld [vmem:[%s1412_s1 + $0xc8] sm:$0xff]   ;;  %v1056_v10 = vld [vmem:[%s1412_s1 + $0xd0] sm:$0xff]  }
   0x4   :  { %v1049_v3 = vld [vmem:[%s1412_s1 + $0x80] sm:$0xff]   ;;  %934 = vmatprep.subr.bf16.mxu1 %v1048_v2  ;;  %914 = vmatprep.subr.bf16.mxu0 %v1050_v4  ;;  %v1053_v7 = vld [vmem:[%s1412_s1 + $0x88] sm:$0xff]   ;;  %v1057_v11 = vld [vmem:[%s1412_s1 + $0x90] sm:$0xff]  }
   0x5   :  { %935 = vmatpush3.bf16.msra.mxu1 %v1049_v3  ;;  %v1058_v12 = vld [vmem:[%s1412_s1 + $0x58] sm:$0xff]   ;;  %v1062_v16 = vld [vmem:[%s1412_s1 + $0x60] sm:$0xff]   ;;  %v1066_v20 = vld [vmem:[%s1412_s1 + $0x68] sm:$0xff]  }
   0x6   :  { %936 = vmatprep.subr.bf16.mxu1 %v1052_v6  ;;  %v1059_v13 = vld [vmem:[%s1412_s1 + $0x18] sm:$0xff]   ;;  %v1063_v17 = vld [vmem:[%s1412_s1 + $0x20] sm:$0xff]   ;;  %v1067_v21 = vld [vmem:[%s1412_s1 + $0x28] sm:$0xff]  }
   0x7   :  { %915 = vmatpush3.bf16.msra.mxu0 %v1051_v5  ;;  %v1060_v14 = vld [vmem:[%s1412_s1 + $0xd8] sm:$0xff]   ;;  %v1064_v18 = vld [vmem:[%s1412_s1 + $0xe0] sm:$0xff]   ;;  %v1068_v22 = vld [vmem:[%s1412_s1 + $0xe8] sm:$0xff]  }
   0x8   :  { %916 = vmatprep.subr.bf16.mxu0 %v1054_v8  ;;  %v1061_v15 = vld [vmem:[%s1412_s1 + $0x98] sm:$0xff]   ;;  %v1065_v19 = vld [vmem:[%s1412_s1 + $0xa0] sm:$0xff]   ;;  %v1069_v23 = vld [vmem:[%s1412_s1 + $0xa8] sm:$0xff]  }
   0x9   :  { %937 = vmatpush3.bf16.msra.mxu1 %v1053_v7  ;;  %v1070_v24 = vld [vmem:[%s1412_s1 + $0x70] sm:$0xff]   ;;  %v1074_v28 = vld [vmem:[%s1412_s1 + $0x78] sm:$0xff]   ;;  %v30_v31 = vld [vmem:[%s1413_s0 + $0x8] sm:$0xff] }
   0xa   :  { %938 = vmatprep.subr.bf16.mxu1 %v1056_v10  ;;  %v1071_v25 = vld [vmem:[%s1412_s1 + $0x30] sm:$0xff]   ;;  %v1075_v29 = vld [vmem:[%s1412_s1 + $0x38] sm:$0xff]   ;;  %v37_v32 = vpack.c.bf16 %v30_v31, %v30_v31  ;;  %v29_v34 = vld [vmem:[%s1413_s0] sm:$0xff] }
   0xb   :  { %917 = vmatpush3.bf16.msra.mxu0 %v1055_v9  ;;  %v1072_v26 = vld [vmem:[%s1412_s1 + $0xf0] sm:$0xff]   ;;  %v1076_v30 = vld [vmem:[%s1412_s1 + $0xf8] sm:$0xff]   ;;  %v36_v35 = vpack.c.bf16 %v29_v34, %v29_v34  ;;  %v1078_v36 = vld [vmem:[%s1412_s1 + $0x140] sm:$0xff]  }
   0xc   :  { %918 = vmatprep.subr.bf16.mxu0 %v1058_v12  ;;  %v1073_v27 = vld [vmem:[%s1412_s1 + $0xb0] sm:$0xff]   ;;  %v1077_v33 = vld [vmem:[%s1412_s1 + $0xb8] sm:$0xff]   ;;  %478 = vmatprep.mubr.bf16.mxu0 %v37_v32  ;;  %v1079_v39 = vld [vmem:[%s1412_s1 + $0x100] sm:$0xff]  }
   0xd   :  { %939 = vmatpush3.bf16.msra.mxu1 %v1057_v11  ;;  %v32_v37 = vld [vmem:[%s1413_s0 + $0x18] sm:$0xff]  ;;  %v31_v40 = vld [vmem:[%s1413_s0 + $0x10] sm:$0xff]  ;;  %v1080_v42 = vld [vmem:[%s1412_s1 + $0x148] sm:$0xff]  }
   0xe   :  { %940 = vmatprep.subr.bf16.mxu1 %v1060_v14  ;;  %v39_v38 = vpack.c.bf16 %v32_v37, %v32_v37  ;;  %v38_v41 = vpack.c.bf16 %v31_v40, %v31_v40  ;;  %v1081_v43 = vld [vmem:[%s1412_s1 + $0x108] sm:$0xff]   ;;  %v1082_v45 = vld [vmem:[%s1412_s1 + $0x150] sm:$0xff]   ;;  %v1084_v47 = vld [vmem:[%s1412_s1 + $0x158] sm:$0xff]  }
   0xf   :  { %919 = vmatpush3.bf16.msra.mxu0 %v1059_v13  ;;  %v1083_v46 = vld [vmem:[%s1412_s1 + $0x110] sm:$0xff]   ;;  %v1085_v48 = vld [vmem:[%s1412_s1 + $0x118] sm:$0xff]   ;;  %v1086_v49 = vld [vmem:[%s1412_s1 + $0x160] sm:$0xff]  }
  0x10   :  { %920 = vmatprep.subr.bf16.mxu0 %v1062_v16  ;;  %518 = vmatprep.mubr.bf16.mxu1 %v39_v38  ;;  %v1087_v50 = vld [vmem:[%s1412_s1 + $0x120] sm:$0xff]   ;;  %v1088_v51 = vld [vmem:[%s1412_s1 + $0x168] sm:$0xff]   ;;  %v35_v55 = vld [vmem:[%s1413_s0 + $0x30] sm:$0xff] }
  0x11   :  { %941 = vmatpush3.bf16.msra.mxu1 %v1061_v15  ;;  %v1094_v52 = vld [vmem:[%s1412_s1 + $0x180] sm:$0xff]   ;;  %v34_v53 = vld [vmem:[%s1413_s0 + $0x28] sm:$0xff]  ;;  %v42_v57 = vpack.c.bf16 %v35_v55, %v35_v55  ;;  %v1090_v58 = vld [vmem:[%s1412_s1 + $0x170] sm:$0xff]  }
  0x12   :  { %942 = vmatprep.subr.bf16.mxu1 %v1064_v18  ;;  %v41_v54 = vpack.c.bf16 %v34_v53, %v34_v53  ;;  %v1089_v56 = vld [vmem:[%s1412_s1 + $0x128] sm:$0xff]   ;;  %v1091_v59 = vld [vmem:[%s1412_s1 + $0x130] sm:$0xff]   ;;  %v1092_v60 = vld [vmem:[%s1412_s1 + $0x178] sm:$0xff]  }
  0x13   :  { %921 = vmatpush3.bf16.msra.mxu0 %v1063_v17  ;;  %v1093_v61 = vld [vmem:[%s1412_s1 + $0x138] sm:$0xff]   ;;  %v33_v62 = vld [vmem:[%s1413_s0 + $0x20] sm:$0xff]  ;;  %v1096_v1 = vld [vmem:[%s1414_s3 + $0x8] sm:$0xff]  }
  0x14   :  { %922 = vmatprep.subr.bf16.mxu0 %v1066_v20  ;;  %v40_v63 = vpack.c.bf16 %v33_v62, %v33_v62  ;;  %v1095_v0 = vld [vmem:[%s1414_s3] sm:$0xff]   ;;  %v1097_v2 = vld [vmem:[%s1414_s3 + $0x10] sm:$0xff]   ;;  %v1098_v3 = vld [vmem:[%s1414_s3 + $0x18] sm:$0xff]  }
  0x15   :  { %943 = vmatpush3.bf16.msra.mxu1 %v1065_v19  ;;  %v1099_v4 = vld [vmem:[%s1414_s3 + $0x20] sm:$0xff]   ;;  %v1100_v5 = vld [vmem:[%s1414_s3 + $0x28] sm:$0xff]   ;;  %v1101_v6 = vld [vmem:[%s1414_s3 + $0x30] sm:$0xff]  }
  0x16   :  { %944 = vmatprep.subr.bf16.mxu1 %v1068_v22  ;;  %v1102_v7 = vld [vmem:[%s1414_s3 + $0x38] sm:$0xff]   ;;  %v1103_v8 = vld [vmem:[%s1415_s5] sm:$0xff]   ;;  %v1104_v9 = vld [vmem:[%s1415_s5 + $0x8] sm:$0xff]  }
  0x17   :  { %923 = vmatpush3.bf16.msra.mxu0 %v1067_v21  ;;  %v1105_v10 = vld [vmem:[%s1415_s5 + $0x10] sm:$0xff]   ;;  %v1106_v11 = vld [vmem:[%s1415_s5 + $0x18] sm:$0xff]   ;;  %v1107_v12 = vld [vmem:[%s1415_s5 + $0x20] sm:$0xff]  }
  0x18   :  { %924 = vmatprep.subr.bf16.mxu0 %v1070_v24  ;;  %v1108_v13 = vld [vmem:[%s1415_s5 + $0x28] sm:$0xff]   ;;  %v843_v15 = vld [vmem:[%s1416_s2] ss:$0 sm:$0xff]  ;;  %v1109_v40 = vld [vmem:[%s1415_s5 + $0x30] sm:$0xff]  }
  0x19   :  { %945 = vmatpush3.bf16.msra.mxu1 %v1069_v23 }
  0x1a   :  { %946 = vmatprep.subr.bf16.mxu1 %v1072_v26 }
  0x1b   :  { %925 = vmatpush3.bf16.msra.mxu0 %v1071_v25 }
  0x1c   :  { %926 = vmatprep.subr.bf16.mxu0 %v1074_v28 }
  0x1d   :  { %947 = vmatpush3.bf16.msra.mxu1 %v1073_v27 }
  0x1e   :  { %948 = vmatprep.subr.bf16.mxu1 %v1076_v30 }
  0x1f   :  { %927 = vmatpush3.bf16.msra.mxu0 %v1075_v29 }
  0x20   :  { %956 = vmatprep.subr.bf16.mxu0 %v1078_v36 }
  0x21   :  { %949 = vmatpush3.bf16.msra.mxu1 %v1077_v33 }
  0x22   :  { %479 = vmatmul.mubr.bf16.vlgmr.msra.gmra.mrb[0].mxu0 %v36_v35  ;;  %998 = vmatprep.subr.bf16.mxu1 %v1111_v44 }
  0x23   :  { %957 = vmatpush3.bf16.msra.mxu0 %v1079_v39  ;;  %558 = vmatprep.mubr.bf16.mxu0 %v41_v54 }
  0x24   :  { %519 = vmatmul.mubr.bf16.vlgmr.msra.gmra.mrb[0].mxu1 %v38_v41  ;;  %958 = vmatprep.subr.bf16.mxu0 %v1080_v42  ;;  %v1110_v41 = vld [vmem:[%s1415_s5 + $0x38] sm:$0xff]   ;;  %v894_v42 = vld [vmem:[%s1417_s4] ss:$0 sm:$0xff] }
  0x25   :  { %1000 = vmatprep.mubr.msk.bf16.mxu1 %vm1112_vm0, %v1111_v44  ;;  %999 = vmatpush3.bf16.msra.mxu1 %v1094_v52 }
  0x26   :  { %1004 = vmatprep.subr.bf16.mxu1 %v1111_v44 }
  0x27   :  { %959 = vmatpush3.bf16.msra.mxu0 %v1081_v43 }
  0x28   :  { %960 = vmatprep.subr.bf16.mxu0 %v1082_v45 }
  0x2b   :  { %961 = vmatpush3.bf16.msra.mxu0 %v1083_v46 }
  0x2c   :  { %962 = vmatprep.subr.bf16.mxu0 %v1084_v47  ;;  %1001 = vmatmul.mubr.msk.bf16.vlgmr.msra.gmra.mrb[4].mxu1 %vm442_vm1, %v42_v57 }
  0x2d   :  { %1020 = vmatprep.mubr.msk.bf16.mxu1 %vm1112_vm0, %v1111_v44  ;;  %1005 = vmatpush3.bf16.msra.mxu1 %v1095_v0 }
  0x2e   :  { %1006 = vmatprep.subr.bf16.mxu1 %v1111_v44 }
  0x2f   :  { %963 = vmatpush3.bf16.msra.mxu0 %v1085_v48 }
  0x30   :  { %964 = vmatprep.subr.bf16.mxu0 %v1086_v49 }
  0x31   :  { %1007 = vmatpush3.bf16.msra.mxu1 %v1096_v1 }
  0x32   :  { %1008 = vmatprep.subr.bf16.mxu1 %v1111_v44 }
  0x33   :  { %965 = vmatpush3.bf16.msra.mxu0 %v1087_v50 }
  0x34   :  { %966 = vmatprep.subr.bf16.mxu0 %v1088_v51 }
  0x35   :  { %1009 = vmatpush3.bf16.msra.mxu1 %v1097_v2 }
  0x36   :  { %1010 = vmatprep.subr.bf16.mxu1 %v1111_v44 }
  0x37   :  { %967 = vmatpush3.bf16.msra.mxu0 %v1089_v56 }
  0x38   :  { %968 = vmatprep.subr.bf16.mxu0 %v1090_v58 }
  0x39   :  { %1011 = vmatpush3.bf16.msra.mxu1 %v1098_v3 }
  0x3a   :  { %1012 = vmatprep.subr.bf16.mxu1 %v1111_v44 }
  0x3b   :  { %969 = vmatpush3.bf16.msra.mxu0 %v1091_v59 }
  0x3c   :  { %970 = vmatprep.subr.bf16.mxu0 %v1092_v60 }
  0x3d   :  { %1013 = vmatpush3.bf16.msra.mxu1 %v1099_v4 }
  0x3e   :  { %1014 = vmatprep.subr.bf16.mxu1 %v1111_v44 }
  0x3f   :  { %971 = vmatpush3.bf16.msra.mxu0 %v1093_v61 }
  0x40   :  { %1024 = vmatprep.subr.bf16.mxu0 %v1111_v44 }
  0x41   :  { %1015 = vmatpush3.bf16.msra.mxu1 %v1100_v5 }
  0x42   :  { %559 = vmatmul.mubr.bf16.vlgmr.msra.gmra.mrb[4].mxu0 %v40_v63  ;;  %1016 = vmatprep.subr.bf16.mxu1 %v1111_v44 }
  0x43   :  { %1040 = vmatprep.mubr.msk.bf16.mxu0 %vm1112_vm0, %v1111_v44  ;;  %1025 = vmatpush3.bf16.msra.mxu0 %v1103_v8 }
  0x44   :  { %1026 = vmatprep.subr.bf16.mxu0 %v1111_v44 }
  0x45   :  { %1017 = vmatpush3.bf16.msra.mxu1 %v1101_v6 }
  0x46   :  { %1018 = vmatprep.subr.bf16.mxu1 %v1111_v44 }
  0x47   :  { %1027 = vmatpush3.bf16.msra.mxu0 %v1104_v9 }
  0x48   :  { %1028 = vmatprep.subr.bf16.mxu0 %v1111_v44 }
  0x49   :  { %1019 = vmatpush3.bf16.msra.mxu1 %v1102_v7 }
  0x4b   :  { %1029 = vmatpush3.bf16.msra.mxu0 %v1105_v10 }
  0x4c   :  { %1030 = vmatprep.subr.bf16.mxu0 %v1111_v44 }
  0x4f   :  { %1031 = vmatpush3.bf16.msra.mxu0 %v1106_v11 }
  0x50   :  { %1032 = vmatprep.subr.bf16.mxu0 %v1111_v44 }
  0x53   :  { %1033 = vmatpush3.bf16.msra.mxu0 %v1107_v12 }
  0x54   :  { %1034 = vmatprep.subr.bf16.mxu0 %v1111_v44 }
  0x57   :  { %1035 = vmatpush3.bf16.msra.mxu0 %v1108_v13 }
  0x58   :  { %1036 = vmatprep.subr.bf16.mxu0 %v1111_v44 }
  0x5b   :  { %1037 = vmatpush3.bf16.msra.mxu0 %v1109_v40 }
  0x5c   :  { %1038 = vmatprep.subr.bf16.mxu0 %v1111_v44  ;;  %v903_v44 = vld [vmem:[%s1419_s6] ss:$0 sm:$0xff] }
  0x5f   :  { %1039 = vmatpush3.bf16.msra.mxu0 %v1110_v41 }
  0xf5   :  { %v928_v14 = vpop.f32.mrb[0].mxu0 }
  0xf6   :  { %v929_v16 = vpop.f32.mrb[1].mxu0 }
  0xf7   :  { %v930_v17 = vadd.f32 %v929_v16, %v928_v14  ;;  %v931_v18 = vpop.f32.mrb[2].mxu0  ;;  %v950_v19 = vpop.f32.mrb[0].mxu1 }
  0xf8   :  { %v932_v20 = vpop.f32.mrb[3].mxu0  ;;  %v951_v22 = vpop.f32.mrb[1].mxu1 }
  0xf9   :  { %v481_v21 = vadd.f32 %v930_v17, %v843_v15  ;;  %v952_v23 = vadd.f32 %v951_v22, %v950_v19  ;;  %v953_v24 = vpop.f32.mrb[2].mxu1 }
  0xfa   :  { %v954_v25 = vpop.f32.mrb[3].mxu1 }
  0xfb   :  { %v521_v26 = vadd.f32 %v952_v23, %v481_v21 }
  0xff   :  { %v600_v27 = vpop.f32.mrb[4].mxu1 }
 0x100   :  { %v1002_v28 = vpop.f32.mrb[5].mxu1 }
 0x101   :  { %v603_v29 = vpop.f32.mrb[6].mxu1 }
 0x102   :  { %v1003_v30 = vpop.f32.mrb[7].mxu1 }
 0x115   :  { %v972_v31 = vpop.f32.mrb[4].mxu0 }
 0x116   :  { %v973_v32 = vpop.f32.mrb[5].mxu0 }
 0x117   :  { %v974_v33 = vadd.f32 %v973_v32, %v972_v31  ;;  %v975_v34 = vpop.f32.mrb[6].mxu0 }
 0x118   :  { %v976_v35 = vpop.f32.mrb[7].mxu0 }
 0x119   :  { %v561_v36 = vadd.f32 %v974_v33, %v521_v26 }
 0x11b   :  { %v601_v37 = vadd.f32 %v600_v27, %v561_v36 }
 0x11d   :  { %v606_v38 = vmax.f32 %v601_v37, 0.0 }
 0x11f   :  { %v607_v39 = vpack.c.bf16 %v606_v38, %v606_v38 }
 0x121   :  { %1021 = vmatmul.mubr.bf16.vlgmr.msra.gmra.mrb[8].mxu1 %v607_v39 }
 0x1f4   :  { %v713_v43 = vpop.f32.mrb[8].mxu1 }
 0x1f5   :  { %v714_v45 = vadd.f32 %v894_v42, %v713_v43  ;;  %v1022_v46 = vpop.f32.mrb[9].mxu1 }
 0x1f6   :  { %v716_v47 = vpop.f32.mrb[10].mxu1 }
 0x1f7   :  { %v719_v48 = vmax.f32 %v714_v45, 0.0  ;;  %v1023_v49 = vpop.f32.mrb[11].mxu1 }
 0x1f9   :  { %v720_v50 = vpack.c.bf16 %v719_v48, %v719_v48 }
 0x1fb   :  { %721 = vst [vmem:[%s1418_s8] sm:$0xf] %v720_v50  ;;  %1041 = vmatmul.mubr.bf16.vlgmr.msra.gmra.mrb[8].mxu0 %v720_v50 }
 0x2ce   :  { %v827_v51 = vpop.f32.mrb[8].mxu0 }
 0x2cf   :  { %v828_v52 = vadd.f32 %v903_v44, %v827_v51  ;;  %v1042_v53 = vpop.f32.mrb[9].mxu0 }
 0x2d0   :  { %v830_v54 = vpop.f32.mrb[10].mxu0 }
 0x2d1   :  { %v833_v55 = vpack.c.bf16 %v828_v52, %v828_v52  ;;  %v1043_v56 = vpop.f32.mrb[11].mxu0 }
 0x2d3   :  { %834 = vst [vmem:[%s1420_s7] sm:$0xf] %v833_v55 }

</bundles_post_ra>
